<compile_context>
chip_gen: v7x
topology: tpu7x:2x2x1
jax: 0.10.0
libtpu: 0.0.40
codegen_flags: <defaults>
</compile_context>

<pallas_src>
import math

import jax
import jax.numpy as jnp
from jax import lax
from jax.experimental import pallas as pl
from jax.experimental.pallas import tpu as pltpu

_LANES = 128
_LOG_LO = math.log(1e-4)
_LOG_HI = math.log(1.0 - 1e-4)


def _vmem_capacity_bytes():
    """Physical per-TensorCore VMEM (v5e/v6e: 128 MiB, v7x: 64 MiB)."""
    try:
        cap = getattr(pltpu.get_tpu_info(), "vmem_capacity_bytes", None)
        if cap:
            return int(cap)
    except Exception:
        pass
    return 64 << 20  # conservative default (v7x-sized)


# ----------------------------------------------------------------------------
# Kernel 1: _sigmoid + CenterNet focal loss partial sums per (batch, C-chunk).
# ----------------------------------------------------------------------------
def _focal_kernel(x_ref, gt_ref, out_ref):
    x = x_ref[...].astype(jnp.float32)       # (1, Ct, HWr, 128) raw logits
    gt = gt_ref[...].astype(jnp.float32)     # (1, Ct, HWr, 128) gt heatmap

    # _sigmoid(x) = clamp(sigmoid(x), 1e-4, 1-1e-4); sigmoid via a single EUP
    # tanh push instead of exp + reciprocal: sigmoid(x) = 0.5*tanh(x/2) + 0.5.
    s = 0.5 * jnp.tanh(0.5 * x) + 0.5
    pred = jnp.clip(s, 1e-4, 1.0 - 1e-4)

    # One log per element:
    #   log(clip(s))     == clip(log(s), log(1e-4), log(1-1e-4))
    #   log(1 - clip(s)) == clip(log(s) - x, ...)   (s == 0 guard: log(1-0) = 0)
    lp = jnp.log(s)
    log_pred = jnp.clip(lp, _LOG_LO, _LOG_HI)
    lq = jnp.where(s > 0.0, lp - x, 0.0)
    log_npred = jnp.clip(lq, _LOG_LO, _LOG_HI)

    pos_inds = (gt == 1.0).astype(jnp.float32)
    neg_inds = (gt < 1.0).astype(jnp.float32)
    q = 1.0 - gt
    neg_w = (q * q) * (q * q)                # pow(1-gt, 4) -> two VPU multiplies

    om = 1.0 - pred
    pos_loss = log_pred * (om * om) * pos_inds
    neg_loss = log_npred * (pred * pred) * neg_w * neg_inds

    # Full reductions are free filler while the kernel sits on the HBM roofline.
    pos_sum = jnp.sum(pos_loss)
    neg_sum = jnp.sum(neg_loss)
    npos = jnp.sum(pos_inds)

    # Pack the three partial sums into distinct lanes of a single output block.
    lane = lax.broadcasted_iota(jnp.int32, (8, _LANES), 1)
    res = jnp.where(lane == 0, pos_sum, 0.0)
    res = jnp.where(lane == 1, neg_sum, res)
    res = jnp.where(lane == 2, npos, res)
    out_ref[...] = res[None, None]


def _pick_c_tile(C, HW, itemsize, vmem_cap, min_chunks=1):
    """Largest divisor of C whose input block fits the per-block VMEM budget."""
    # ~2-4 MiB blocks reach ~85%+ of the HBM roofline; clamp so that
    # 2 inputs x 2 pipeline buffers + ~10x block of f32 temporaries stay well
    # under physical VMEM (64 MiB on v7x).
    per_blk_budget = max(HW * itemsize, min(4 << 20, vmem_cap // 24))
    max_tile = max(1, min(C, per_blk_budget // (HW * itemsize)))
    if min_chunks > 1 and C >= min_chunks:
        max_tile = min(max_tile, max(1, C // min_chunks))
    best = 1
    for d in range(1, C + 1):
        if C % d == 0 and d <= max_tile:
            best = d
    return best


def focal_loss(hm_logits, hm_gt, c_tile=None):
    """CenterNet FocalLoss (_neg_loss) on raw logits (applies _sigmoid inside).

    Accepts f32 or bf16 inputs (upcast to f32 in VMEM).  To get the bf16 HBM
    saving, emit the head/gt in bf16 upstream -- do NOT cast in this wrapper
    (that costs a full extra HBM round trip) and keep gt peaks exactly 1.0
    (bf16 rounding of near-peak Gaussians would corrupt num_pos).
    Returns (total_loss, per_batch_loss[B]).
    """
    B, C, H, W = hm_logits.shape
    HW = H * W
    assert HW % _LANES == 0, "H*W must be a multiple of 128"
    HWr = HW // _LANES

    vmem_cap = _vmem_capacity_bytes()
    itemsize = jnp.dtype(hm_logits.dtype).itemsize
    if c_tile is None:
        # Keep >= 2 channel chunks when B == 1 so both v7x TensorCores get work.
        c_tile = _pick_c_tile(C, HW, itemsize, vmem_cap,
                              min_chunks=2 if B == 1 else 1)
    assert C % c_tile == 0
    nc = C // c_tile

    x = hm_logits.reshape(B, C, HWr, _LANES)   # free reshape, lane-dense
    g = hm_gt.reshape(B, C, HWr, _LANES)

    blk_bytes = c_tile * HW * itemsize
    f32_blk = c_tile * HW * 4
    vmem_limit = int(min(int(0.75 * vmem_cap),
                         max(32 << 20, 4 * blk_bytes + 10 * f32_blk + (4 << 20))))

    blk = (1, c_tile, HWr, _LANES)
    out = pl.pallas_call(
        _focal_kernel,
        grid=(B, nc),
        in_specs=[pl.BlockSpec(blk, lambda b, c: (b, c, 0, 0)),
                  pl.BlockSpec(blk, lambda b, c: (b, c, 0, 0))],
        out_specs=pl.BlockSpec((1, 1, 8, _LANES), lambda b, c: (b, c, 0, 0)),
        out_shape=jax.ShapeDtypeStruct((B, nc, 8, _LANES), jnp.float32),
        compiler_params=pltpu.CompilerParams(
            dimension_semantics=("parallel", "parallel"),
            vmem_limit_bytes=vmem_limit),
    )(x, g)

    pos = jnp.sum(out[:, :, 0, 0], axis=1)
    neg = jnp.sum(out[:, :, 0, 1], axis=1)
    npos = jnp.sum(out[:, :, 0, 2], axis=1)

    tot_pos, tot_neg, tot_np = jnp.sum(pos), jnp.sum(neg), jnp.sum(npos)
    loss = jnp.where(tot_np == 0.0, -tot_neg,
                     -(tot_pos + tot_neg) / jnp.maximum(tot_np, 1.0))
    # TODO(synk): exact definition of FocalLoss's second return value is not in
    # the snippet; interpreted here as the per-sample focal loss vector.
    batch_loss = jnp.where(npos == 0.0, -neg, -(pos + neg) / jnp.maximum(npos, 1.0))
    return loss, batch_loss


# ----------------------------------------------------------------------------
# Kernel 2: fused RegL1Loss for the 'wh' and 'reg' heads.
# Phase 1: unrolled addressed sublane-slice gather (ind in SMEM) into VMEM
#          scratch.  Phase 2: one vectorized lane-masked L1 reduce.
# ----------------------------------------------------------------------------
def reg_l1_pair(wh_map, reg_map, mask, ind, wh_tgt, reg_tgt, k_split=None):
    """Fused RegL1Loss for 'wh' and 'reg' (shared ind/mask, one gather pass).

    Returns (wh_loss, batch_wh_loss[B], off_loss, batch_off_loss[B]).
    """
    B, C, H, W = wh_map.shape
    K = ind.shape[1]
    HW = H * W
    assert HW % _LANES == 0, "H*W must be a multiple of 128"
    HWr = HW // _LANES
    assert reg_map.shape == (B, C, H, W)
    assert wh_tgt.shape == (B, K, C) and reg_tgt.shape == (B, K, C)

    # v7x has 2 TensorCores: keep the parallel grid product >= 2 when B == 1 by
    # splitting the K objects across a second parallel grid axis.
    if k_split is None:
        k_split = 2 if (B == 1 and K % 2 == 0 and ((K // 2) * C) % 8 == 0) else 1
    S = k_split
    assert K % S == 0
    Kh = K // S

    # Free reshapes only -- no NCHW -> NHWC transpose pass over the feature maps
    # and no transposes of the tiny targets (natural (B, K, C) layout kept).
    whf = wh_map.reshape(B, C * HWr, _LANES)
    regf = reg_map.reshape(B, C * HWr, _LANES)
    ind_i = ind.astype(jnp.int32)                                       # (B, K) -> SMEM
    cols = jnp.repeat((ind_i % _LANES)[:, :, None], C, axis=1)          # (B, K*C, 1)
    mrep = jnp.repeat(mask.astype(jnp.float32)[:, :, None], C, axis=1)  # (B, K*C, 1)
    wh_t = wh_tgt.astype(jnp.float32).reshape(B, K * C, 1)
    rg_t = reg_tgt.astype(jnp.float32).reshape(B, K * C, 1)

    unroll = max(1, min(Kh, 8))

    def kernel(ind_ref, cols_ref, mask_ref, whf_ref, regf_ref, wht_ref, regt_ref,
               out_ref, wh_scr, rg_scr):
        b = pl.program_id(0)
        s = pl.program_id(1)
        k0 = s * Kh

        # Phase 1: Kh addressed (1, 128) sublane reads from the lane-dense
        # feature maps into VMEM scratch.  No math -> short dependence chain;
        # partially unrolled so the scheduler overlaps the reads.
        def gather(j, carry):
            idx = ind_ref[b, k0 + j]                       # SMEM scalar read
            row = idx // _LANES
            base = j * C
            for c in range(C):                             # static (C == 2)
                wh_scr[pl.ds(base + c, 1), :] = (
                    whf_ref[0, pl.ds(c * HWr + row, 1), :].astype(jnp.float32))
                rg_scr[pl.ds(base + c, 1), :] = (
                    regf_ref[0, pl.ds(c * HWr + row, 1), :].astype(jnp.float32))
            return carry

        lax.fori_loop(0, Kh, gather, 0, unroll=unroll)

        # Phase 2: a single vectorized lane-masked L1 reduce over the whole
        # (Kh*C, 128) gathered block (replaces Kh serial cross-lane reduces).
        lane = lax.broadcasted_iota(jnp.int32, (Kh * C, _LANES), 1)
        oh = (lane == cols_ref[0]).astype(jnp.float32)     # (Kh*C, 128) one-hot
        m = mask_ref[0]                                    # (Kh*C, 1)
        # F.l1_loss(pred * mask, target * mask, reduction='sum')
        l1_wh = jnp.sum(jnp.abs((wh_scr[...] - wht_ref[0]) * oh) * m)
        l1_rg = jnp.sum(jnp.abs((rg_scr[...] - regt_ref[0]) * oh) * m)
        msum = jnp.sum(m)            # == mask.expand_as(pred).sum() (this slice)

        lane8 = lax.broadcasted_iota(jnp.int32, (8, _LANES), 1)
        res = jnp.where(lane8 == 0, l1_wh, 0.0)
        res = jnp.where(lane8 == 1, l1_rg, res)
        res = jnp.where(lane8 == 2, msum, res)
        out_ref[...] = res[None, None]

    out = pl.pallas_call(
        kernel,
        grid_spec=pltpu.PrefetchScalarGridSpec(
            num_scalar_prefetch=1,
            grid=(B, S),
            in_specs=[
                pl.BlockSpec((1, Kh * C, 1), lambda b, s, ind: (b, s, 0)),
                pl.BlockSpec((1, Kh * C, 1), lambda b, s, ind: (b, s, 0)),
                pl.BlockSpec((1, C * HWr, _LANES), lambda b, s, ind: (b, 0, 0)),
                pl.BlockSpec((1, C * HWr, _LANES), lambda b, s, ind: (b, 0, 0)),
                pl.BlockSpec((1, Kh * C, 1), lambda b, s, ind: (b, s, 0)),
                pl.BlockSpec((1, Kh * C, 1), lambda b, s, ind: (b, s, 0)),
            ],
            out_specs=pl.BlockSpec((1, 1, 8, _LANES), lambda b, s, ind: (b, s, 0, 0)),
            scratch_shapes=[pltpu.VMEM((Kh * C, _LANES), jnp.float32),
                            pltpu.VMEM((Kh * C, _LANES), jnp.float32)],
        ),
        out_shape=jax.ShapeDtypeStruct((B, S, 8, _LANES), jnp.float32),
        compiler_params=pltpu.CompilerParams(
            dimension_semantics=("parallel", "parallel")),
    )(ind_i, cols, mrep, whf, regf, wh_t, rg_t)

    l1_wh = jnp.sum(out[:, :, 0, 0], axis=1)
    l1_off = jnp.sum(out[:, :, 0, 1], axis=1)
    msum = jnp.sum(out[:, :, 0, 2], axis=1)

    wh_loss = jnp.sum(l1_wh) / (jnp.sum(msum) + 1e-4)
    off_loss = jnp.sum(l1_off) / (jnp.sum(msum) + 1e-4)
    # TODO(synk): second return value of the tuple-returning RegL1Loss assumed
    # to be the per-sample normalized L1 loss.
    batch_wh = l1_wh / (msum + 1e-4)
    batch_off = l1_off / (msum + 1e-4)
    return wh_loss, batch_wh, off_loss, batch_off


# ----------------------------------------------------------------------------
# CtdetLoss.forward equivalent.
# ----------------------------------------------------------------------------
class Opt:
    num_stacks = 1
    hm_weight = 1.0
    wh_weight = 0.1
    off_weight = 1.0
    reg_offset = True
    hm_c_tile = None       # None => auto-pick the channel tile per chip VMEM
    # TODO(synk): mdn / dense_wh / cat_spec_wh / norm_wh / eval_oracle_* branches
    # and tensorboard histogram logging are not implemented (off by default).


def ctdet_loss(outputs, batch, opt):
    hm_loss = wh_loss = off_loss = 0.0
    b_hm = b_wh = b_off = 0.0
    for s in range(opt.num_stacks):
        out = outputs[s]
        h, bh = focal_loss(out["hm"], batch["hm"],
                           c_tile=getattr(opt, "hm_c_tile", None))
        hm_loss = hm_loss + h / opt.num_stacks
        b_hm = b_hm + bh / opt.num_stacks

        if opt.wh_weight > 0 and opt.reg_offset and opt.off_weight > 0:
            w, bw, o, bo = reg_l1_pair(out["wh"], out["reg"], batch["reg_mask"],
                                       batch["ind"], batch["wh"], batch["reg"])
            wh_loss = wh_loss + w / opt.num_stacks
            b_wh = b_wh + bw / opt.num_stacks
            off_loss = off_loss + o / opt.num_stacks
            b_off = b_off + bo / opt.num_stacks
        # TODO(synk): configs with only one of {wh, reg_offset} enabled would
        # need an unfused single-head RegL1 call; not exercised by defaults.

    loss = opt.hm_weight * hm_loss + opt.wh_weight * wh_loss + opt.off_weight * off_loss
    batch_loss = opt.hm_weight * b_hm + opt.wh_weight * b_wh + opt.off_weight * b_off
    loss_stats = {
        "loss": loss, "hm_loss": hm_loss, "wh_loss": wh_loss, "off_loss": off_loss,
        "batch_loss": batch_loss, "batch_hm_loss": b_hm,
        "batch_wh_loss": b_wh, "batch_off_loss": b_off,
    }
    return loss, loss_stats


if __name__ == "__main__":
    B, C, H, W, K = 2, 4, 16, 16, 8
    key = jax.random.PRNGKey(0)
    k1, k2, k3, k4, k5, k6 = jax.random.split(key, 6)

    # network outputs (NCHW, as from PyTorch convs); 'hm' are raw logits.
    outputs = [{
        "hm": jax.random.normal(k1, (B, C, H, W), jnp.float32),
        "wh": jax.random.normal(k2, (B, 2, H, W), jnp.float32) * 4.0,
        "reg": jax.random.normal(k3, (B, 2, H, W), jnp.float32) * 0.5,
    }]

    # ground-truth batch
    hm_gt = jnp.clip(jax.random.uniform(k4, (B, C, H, W), jnp.float32), 0.0, 0.98)
    ind = jnp.array([[(b * 37 + k * 19) % (H * W) for k in range(K)] for b in range(B)],
                    dtype=jnp.int32)
    cls = jnp.array([[k % C for k in range(K)] for _ in range(B)], dtype=jnp.int32)
    ys, xs = ind // W, ind % W
    for b in range(B):
        for k in range(5):  # 5 "real" objects per image -> peaks of exactly 1.0
            hm_gt = hm_gt.at[b, int(cls[b, k]), int(ys[b, k]), int(xs[b, k])].set(1.0)
    reg_mask = jnp.array([[1.0 if k < 5 else 0.0 for k in range(K)] for _ in range(B)],
                         dtype=jnp.float32)
    batch = {
        "hm": hm_gt,
        "reg_mask": reg_mask,
        "ind": ind,
        "wh": jnp.abs(jax.random.normal(k5, (B, K, 2), jnp.float32)) * 3.0,
        "reg": jax.random.uniform(k6, (B, K, 2), jnp.float32),
    }

    loss, stats = ctdet_loss(outputs, batch, Opt())
    jax.block_until_ready(loss)
    jax.block_until_ready(stats["batch_loss"])
    print("KERNEL_OK")
</pallas_src>

<mosaic_0001>
module attributes {stable_mosaic.version = 11 : i64} {
  func.func @_focal_kernel(%arg0: i32, %arg1: i32, %arg2: memref<1x4x2x128xf32, #tpu.memory_space<vmem>>, %arg3: memref<1x4x2x128xf32, #tpu.memory_space<vmem>>, %arg4: memref<1x1x8x128xf32, #tpu.memory_space<vmem>>) attributes {dimension_semantics = [#tpu.dimension_semantics<parallel>, #tpu.dimension_semantics<parallel>], iteration_bounds = array<i64: 2, 1>, scalar_prefetch = 0 : i64, scratch_operands = 0 : i64, tpu.core_type = #tpu.core_type<tc>, window_params = [{transform_indices = @transform_0, window_bounds = array<i64: 1, 4, 2, 128>}, {transform_indices = @transform_1, window_bounds = array<i64: 1, 4, 2, 128>}, {transform_indices = @transform_2, window_bounds = array<i64: 1, 1, 8, 128>}]} {
    %c0 = arith.constant 0 : index
    %c0_0 = arith.constant 0 : index
    %c0_1 = arith.constant 0 : index
    %c0_2 = arith.constant 0 : index
    %0 = vector.load %arg2[%c0, %c0_0, %c0_1, %c0_2] : memref<1x4x2x128xf32, #tpu.memory_space<vmem>>, vector<1x4x2x128xf32>
    %c0_3 = arith.constant 0 : index
    %c0_4 = arith.constant 0 : index
    %c0_5 = arith.constant 0 : index
    %c0_6 = arith.constant 0 : index
    %1 = vector.load %arg3[%c0_3, %c0_4, %c0_5, %c0_6] : memref<1x4x2x128xf32, #tpu.memory_space<vmem>>, vector<1x4x2x128xf32>
    %cst = arith.constant 5.000000e-01 : f32
    %2 = vector.broadcast %cst : f32 to vector<1x4x2x128xf32>
    %3 = arith.mulf %2, %0 : vector<1x4x2x128xf32>
    %4 = math.tanh %3 : vector<1x4x2x128xf32>
    %cst_7 = arith.constant 5.000000e-01 : f32
    %5 = vector.broadcast %cst_7 : f32 to vector<1x4x2x128xf32>
    %6 = arith.mulf %5, %4 : vector<1x4x2x128xf32>
    %cst_8 = arith.constant 5.000000e-01 : f32
    %7 = vector.broadcast %cst_8 : f32 to vector<1x4x2x128xf32>
    %8 = arith.addf %6, %7 : vector<1x4x2x128xf32>
    %cst_9 = arith.constant 9.99999974E-5 : f32
    %cst_10 = arith.constant 0.999899983 : f32
    %9 = vector.broadcast %cst_9 : f32 to vector<1x4x2x128xf32>
    %10 = arith.maximumf %9, %8 : vector<1x4x2x128xf32>
    %11 = vector.broadcast %cst_10 : f32 to vector<1x4x2x128xf32>
    %12 = arith.minimumf %11, %10 : vector<1x4x2x128xf32>
    %13 = math.log %8 : vector<1x4x2x128xf32>
    %cst_11 = arith.constant -9.21034049 : f32
    %cst_12 = arith.constant -1.000050e-04 : f32
    %14 = vector.broadcast %cst_11 : f32 to vector<1x4x2x128xf32>
    %15 = arith.maximumf %14, %13 : vector<1x4x2x128xf32>
    %16 = vector.broadcast %cst_12 : f32 to vector<1x4x2x128xf32>
    %17 = arith.minimumf %16, %15 : vector<1x4x2x128xf32>
    %cst_13 = arith.constant 0.000000e+00 : f32
    %18 = vector.broadcast %cst_13 : f32 to vector<1x4x2x128xf32>
    %19 = arith.cmpf ogt, %8, %18 : vector<1x4x2x128xf32>
    %20 = arith.subf %13, %0 : vector<1x4x2x128xf32>
    %cst_14 = arith.constant 0.000000e+00 : f32
    %21 = vector.broadcast %cst_14 : f32 to vector<1x4x2x128xf32>
    %22 = arith.select %19, %20, %21 : vector<1x4x2x128xi1>, vector<1x4x2x128xf32>
    %cst_15 = arith.constant -9.21034049 : f32
    %cst_16 = arith.constant -1.000050e-04 : f32
    %23 = vector.broadcast %cst_15 : f32 to vector<1x4x2x128xf32>
    %24 = arith.maximumf %23, %22 : vector<1x4x2x128xf32>
    %25 = vector.broadcast %cst_16 : f32 to vector<1x4x2x128xf32>
    %26 = arith.minimumf %25, %24 : vector<1x4x2x128xf32>
    %cst_17 = arith.constant 1.000000e+00 : f32
    %27 = vector.broadcast %cst_17 : f32 to vector<1x4x2x128xf32>
    %28 = arith.cmpf oeq, %1, %27 : vector<1x4x2x128xf32>
    %29 = arith.extui %28 : vector<1x4x2x128xi1> to vector<1x4x2x128xi32>
    %30 = arith.sitofp %29 : vector<1x4x2x128xi32> to vector<1x4x2x128xf32>
    %cst_18 = arith.constant 1.000000e+00 : f32
    %31 = vector.broadcast %cst_18 : f32 to vector<1x4x2x128xf32>
    %32 = arith.cmpf olt, %1, %31 : vector<1x4x2x128xf32>
    %33 = arith.extui %32 : vector<1x4x2x128xi1> to vector<1x4x2x128xi32>
    %34 = arith.sitofp %33 : vector<1x4x2x128xi32> to vector<1x4x2x128xf32>
    %cst_19 = arith.constant 1.000000e+00 : f32
    %35 = vector.broadcast %cst_19 : f32 to vector<1x4x2x128xf32>
    %36 = arith.subf %35, %1 : vector<1x4x2x128xf32>
    %37 = arith.mulf %36, %36 : vector<1x4x2x128xf32>
    %38 = arith.mulf %36, %36 : vector<1x4x2x128xf32>
    %39 = arith.mulf %37, %38 : vector<1x4x2x128xf32>
    %cst_20 = arith.constant 1.000000e+00 : f32
    %40 = vector.broadcast %cst_20 : f32 to vector<1x4x2x128xf32>
    %41 = arith.subf %40, %12 : vector<1x4x2x128xf32>
    %42 = arith.mulf %41, %41 : vector<1x4x2x128xf32>
    %43 = arith.mulf %17, %42 : vector<1x4x2x128xf32>
    %44 = arith.mulf %43, %30 : vector<1x4x2x128xf32>
    %45 = arith.mulf %12, %12 : vector<1x4x2x128xf32>
    %46 = arith.mulf %26, %45 : vector<1x4x2x128xf32>
    %47 = arith.mulf %46, %39 : vector<1x4x2x128xf32>
    %48 = arith.mulf %47, %34 : vector<1x4x2x128xf32>
    %49 = vector.shape_cast %44 : vector<1x4x2x128xf32> to vector<1x1x4x2x128xf32>
    %cst_21 = arith.constant dense<0.000000e+00> : vector<1xf32>
    %50 = vector.multi_reduction <add>, %49, %cst_21 [1, 2, 3, 4] : vector<1x1x4x2x128xf32> to vector<1xf32>
    %51 = vector.shape_cast %50 : vector<1xf32> to vector<1x1x1x1x1xf32>
    %52 = vector.extract %51[0, 0, 0, 0, 0] : f32 from vector<1x1x1x1x1xf32>
    %53 = vector.shape_cast %48 : vector<1x4x2x128xf32> to vector<1x1x4x2x128xf32>
    %cst_22 = arith.constant dense<0.000000e+00> : vector<1xf32>
    %54 = vector.multi_reduction <add>, %53, %cst_22 [1, 2, 3, 4] : vector<1x1x4x2x128xf32> to vector<1xf32>
    %55 = vector.shape_cast %54 : vector<1xf32> to vector<1x1x1x1x1xf32>
    %56 = vector.extract %55[0, 0, 0, 0, 0] : f32 from vector<1x1x1x1x1xf32>
    %57 = vector.shape_cast %30 : vector<1x4x2x128xf32> to vector<1x1x4x2x128xf32>
    %cst_23 = arith.constant dense<0.000000e+00> : vector<1xf32>
    %58 = vector.multi_reduction <add>, %57, %cst_23 [1, 2, 3, 4] : vector<1x1x4x2x128xf32> to vector<1xf32>
    %59 = vector.shape_cast %58 : vector<1xf32> to vector<1x1x1x1x1xf32>
    %60 = vector.extract %59[0, 0, 0, 0, 0] : f32 from vector<1x1x1x1x1xf32>
    %61 = tpu.iota {dimensions = array<i32: 1>} : vector<8x128xi32>
    %c0_i32 = arith.constant 0 : i32
    %62 = vector.broadcast %c0_i32 : i32 to vector<8x128xi32>
    %63 = arith.cmpi eq, %61, %62 : vector<8x128xi32>
    %cst_24 = arith.constant 0.000000e+00 : f32
    %64 = vector.broadcast %52 : f32 to vector<8x128xf32>
    %65 = vector.broadcast %cst_24 : f32 to vector<8x128xf32>
    %66 = arith.select %63, %64, %65 : vector<8x128xi1>, vector<8x128xf32>
    %c1_i32 = arith.constant 1 : i32
    %67 = vector.broadcast %c1_i32 : i32 to vector<8x128xi32>
    %68 = arith.cmpi eq, %61, %67 : vector<8x128xi32>
    %69 = vector.broadcast %56 : f32 to vector<8x128xf32>
    %70 = arith.select %68, %69, %66 : vector<8x128xi1>, vector<8x128xf32>
    %c2_i32 = arith.constant 2 : i32
    %71 = vector.broadcast %c2_i32 : i32 to vector<8x128xi32>
    %72 = arith.cmpi eq, %61, %71 : vector<8x128xi32>
    %73 = vector.broadcast %60 : f32 to vector<8x128xf32>
    %74 = arith.select %72, %73, %70 : vector<8x128xi1>, vector<8x128xf32>
    %75 = vector.shape_cast %74 : vector<8x128xf32> to vector<1x1x8x128xf32>
    %c0_25 = arith.constant 0 : index
    %c0_26 = arith.constant 0 : index
    %c0_27 = arith.constant 0 : index
    %c0_28 = arith.constant 0 : index
    %76 = vector.load %arg4[%c0_25, %c0_26, %c0_27, %c0_28] : memref<1x1x8x128xf32, #tpu.memory_space<vmem>>, vector<1x1x8x128xf32>
    tpu.vector_store %arg4[%c0_25, %c0_26, %c0_27, %c0_28], %75 {strides = array<i32>} : memref<1x1x8x128xf32, #tpu.memory_space<vmem>>, vector<1x1x8x128xf32>,
    return
  }
  func.func @transform_0(%arg0: i32, %arg1: i32) -> (i32, i32, i32, i32) {
    %c0_i32 = arith.constant 0 : i32
    %c0_i32_0 = arith.constant 0 : i32
    %c0_i32_1 = arith.constant 0 : i32
    return %arg0, %arg1, %c0_i32, %c0_i32_0 : i32, i32, i32, i32
  }
  func.func @transform_1(%arg0: i32, %arg1: i32) -> (i32, i32, i32, i32) {
    %c0_i32 = arith.constant 0 : i32
    %c0_i32_0 = arith.constant 0 : i32
    %c0_i32_1 = arith.constant 0 : i32
    return %arg0, %arg1, %c0_i32, %c0_i32_0 : i32, i32, i32, i32
  }
  func.func @transform_2(%arg0: i32, %arg1: i32) -> (i32, i32, i32, i32) {
    %c0_i32 = arith.constant 0 : i32
    %c0_i32_0 = arith.constant 0 : i32
    %c0_i32_1 = arith.constant 0 : i32
    return %arg0, %arg1, %c0_i32, %c0_i32_0 : i32, i32, i32, i32
  }
}

</mosaic_0001>

<bundles_post_ra>
// kernel: tpu_custom_call.1
= control target key start
LH: loop header
LB: loop body
LE: loop exit
PB: predicated region body
PF: predicated region fallthrough
CT: control target
= control target key end

     0   :  { %7 = vsyncpa [#allocation3], 0  ;;  %s1197_s0 = inlined_call_operand.hbm [shape: f32[2,4,2,128], index: 0, kind: input, shape index: {}]   ;;  %s1198_s1 = inlined_call_operand.hbm [shape: f32[2,4,2,128], index: 1, kind: input, shape index: {}]   ;;  %s1199_s2 = inlined_call_operand.hbm [shape: f32[2,1,8,128], index: 2, kind: output, shape index: {}]  }
   0x1   :  { %9 = vsyncpa [#allocation3 + $0x1], 0 }
   0x2   :  { %10 = vsyncpa [#allocation6], 0 }
   0x3   :  { %12 = vsyncpa [#allocation6 + $0x1], 0 }
   0x4   :  { %13 = vsyncpa [#allocation4], 0 }
   0x5   :  { %15 = vsyncpa [#allocation4 + $0x1], 0  ;;  %s835_s9 = smov 0   ;;  %s837_s10 = smov 0  }
   0x6   :  { %s839_s11 = smov 0   ;;  %s841_s12 = smov 0  }
   0x7   :  { %s843_s13 = smov 0   ;;  %s845_s14 = smov 0  }
   0x8 LB: > { %s546_s15 = sadd.s32 4294967295, %s812_s14   ;;  %s547_s16 = sadd.s32 4294967294, %s812_s14   ;;  %s812_s14 = sphi %s845_s14, %s21_s14   ;;  %s808_s13 = sphi %s843_s13, %s1217_s13   ;;  %s804_s12 = sphi %s841_s12, %s1216_s12   ;;  %s800_s11 = sphi %s839_s11, %s1215_s11   ;;  %s796_s10 = sphi %s837_s10, %s1214_s10   ;;  %s792_s9 = sphi %s835_s9, %s1213_s9  }
   0x9   : > { %s33_s17 = sadd.s32 1, %s808_s13  ;;  %s42_s18 = sadd.s32 1, %s800_s11 }
   0xa   : > { %p35_p0 = scmp.ge.s32.totalorder %s33_s17, 2  ;;  %p49_p1 = scmp.ne.s32.totalorder %s800_s11, %s796_s10 }
   0xb   : > { %p50_p2 = scmp.eq.s32.totalorder %s812_s14, 0  ;;  %p55_p3 = scmp.ne.s32.totalorder %s796_s10, %s792_s9 }
   0xc   : > { %s1219_s17 = smov (%p35_p0, %s33_s17), 0  ;;  %p56_p5 = scmp.eq.s32.totalorder %s546_s15, 0 }
   0xd   : > { %p876_p4 = por %p50_p2, %p49_p1  ;;  %s37_s20 = ssub.s32 %s808_s13, %s1219_s17 }
   0xe   : > { %p109_p6 = scmp.eq.s32.totalorder %s546_s15, 1  ;;  %p40_p7 = scmp.eq.s32.totalorder %s37_s20, 0 }
   0xf   : > { %p882_p8 = por %p56_p5, %p55_p3  ;;  %p115_p10 = scmp.eq.s32.totalorder %s547_s16, 1 }
  0x10   : > { %p886_p9 = por %p109_p6, %p49_p1  ;;  %p597_p13 = scmp.lt.s32.totalorder %s812_s14, 2 }
  0x11   : > { %s1203_s21 = scalar_select %p882_p8, 1, 0 }
  0x12   : > { %s1204_s22 = scalar_select %p886_p9, 1, 0 }
  0x13   : > { %s891_s23 = scalar_select %p40_p7, %s800_s11, %s42_s18  }
  0x14   : > { %p893_p11 = por %p115_p10, %p55_p3  ;;  %s900_s25 = sand.u32 1, %s800_s11  }
  0x15   : > { %s550_s26 = sshll.u32 %s900_s25, 3  ;;  %s572_s27 = sshll.u32 %s808_s13, 7 }
  0x16   : > { %s1205_s24 = scalar_select %p893_p11, 1, 0 }
  0x17   : > { %s909_s30 = scalar_lea.hbm %s1197_s0, %s572_s27  ;;  %s139_s3 = scalar_lea.vmem [#allocation2], %s550_s26 }
  0x18   : > { %s148_s4 = sshll.u32 %s139_s3, 4  ;;  %p917_p0 = pnand %p597_p13, %p876_p4  ;;  %s913_s4 = int_to_ptr.vmem [resolvable:$true] %s148_s4 }
  0x19   : > { %s136_s6 = scalar_lea.sflag [#allocation3], %s900_s25  ;;  %s666_s7 = scalar_lea.hbm %s909_s30, 128 }
  0x1a   : > { %p667_p2 = scmp.ne.s32.totalorder %s909_s30, %s666_s7  ;;  %p668_p3 = pneg %p917_p0 }
  0x1b   : > { %s671_s16 = scalar_lea.hbm %s1197_s0, 256  ;;  %p672_p4 = scmp.lt.u32.totalorder %s909_s30, %s1197_s0 }
  0x1c   : > { %p669_p5 = pnand %p668_p3, %p667_p2  ;;  %p673_p7 = scmp.lt.u32.totalorder %s671_s16, %s666_s7 }
  0x1d   : > { %p675_p13 = scmp.lt.u32.totalorder %s666_s7, %s909_s30 }
  0x1e   : > { %p670_p6 = pneg %p669_p5  ;;  %p674_p10 = por %p673_p7, %p672_p4 }
  0x20   : > { %p676_p12 = por %p675_p13, %p674_p10 }
  0x22   : > { %p677_p1 = pnand %p676_p12, %p670_p6 }
  0x24   : > { %680 = shalt.err (!%p677_p1)
}
  0x25   : > { %s681_s20 = scalar_lea.vmem %s913_s4, 128  ;;  %s814_s28 = smov [#allocation2]  }
  0x26   : > { %p682_p2 = scmp.ne.s32.totalorder %s913_s4, %s681_s20  ;;  %s686_s29 = sshll.u32 %s814_s28, 4  ;;  %s687_s29 = int_to_ptr.vmem [resolvable:$false] %s686_s29 }
  0x27   : > { %s688_s3 = scalar_lea.vmem %s687_s29, 256  ;;  %p689_p9 = scmp.lt.s32.totalorder %s913_s4, %s687_s29 }
  0x28   : > { %p684_p5 = pnand %p682_p2, %p668_p3  ;;  %p690_p4 = scmp.lt.s32.totalorder %s688_s3, %s681_s20 }
  0x2a   : > { %p685_p11 = pneg %p684_p5  ;;  %p691_p7 = por %p690_p4, %p689_p9 }
  0x2c   : > { %p692_p10 = pnand %p691_p7, %p685_p11 }
  0x2e   : > { %695 = shalt.err (!%p692_p10)
}
  0x2f   : > { %s815_s7 = smov 32   ;;  %s816_s8 = smov 2  }
  0x30   : > { %589 = dma.hbm_to_vmem [thread:$0]  (!%p917_p0), %s909_s30, 128, %s913_s4, %s136_s6, %s815_s7, %s815_s7, %s816_s8  }
  0x31   : > { %p179_p9 = scmp.lt.s32.totalorder %s812_s14, 3  ;;  %s959_s18 = scalar_lea.hbm %s1198_s1, %s572_s27 }
  0x32   : > { %p1207_p11 = scmp.ge.s32.totalorder %s812_s14, 1  ;;  %s162_s20 = scalar_lea.vmem [#allocation5], %s550_s26 }
  0x33   : > { %s171_s28 = sshll.u32 %s162_s20, 4  ;;  %s159_s30 = scalar_lea.sflag [#allocation6], %s900_s25  ;;  %s969_s28 = int_to_ptr.vmem [resolvable:$true] %s171_s28 }
  0x34   : > { %p963_p12 = pnand %p1207_p11, %p179_p9  ;;  %s696_s4 = scalar_lea.hbm %s959_s18, 128 }
  0x35   : > { %p697_p1 = scmp.ne.s32.totalorder %s959_s18, %s696_s4  ;;  %s701_s29 = scalar_lea.hbm %s1198_s1, 256 }
  0x36   : > { %p702_p2 = scmp.lt.u32.totalorder %s959_s18, %s1198_s1  ;;  %p703_p5 = scmp.lt.u32.totalorder %s701_s29, %s696_s4 }
  0x37   : > { %p699_p6 = pnand %p697_p1, %p668_p3  ;;  %p705_p7 = scmp.lt.u32.totalorder %s696_s4, %s959_s18 }
  0x38   : > { %p704_p4 = por %p703_p5, %p702_p2 }
  0x39   : > { %p700_p13 = pneg %p699_p6 }
  0x3a   : > { %p706_p10 = por %p705_p7, %p704_p4 }
  0x3c   : > { %p707_p9 = pnand %p706_p10, %p700_p13 }
  0x3e   : > { %710 = shalt.err (!%p707_p9)
}
  0x3f   : > { %s711_s26 = scalar_lea.vmem %s969_s28, 128  ;;  %s817_s16 = smov [#allocation5]  }
  0x40   : > { %p712_p11 = scmp.ne.s32.totalorder %s969_s28, %s711_s26  ;;  %s716_s20 = sshll.u32 %s817_s16, 4  ;;  %s717_s20 = int_to_ptr.vmem [resolvable:$false] %s716_s20 }
  0x41   : > { %s718_s27 = scalar_lea.vmem %s717_s20, 256  ;;  %p719_p8 = scmp.lt.s32.totalorder %s969_s28, %s717_s20 }
  0x42   : > { %p714_p1 = pnand %p712_p11, %p668_p3  ;;  %p720_p2 = scmp.lt.s32.totalorder %s718_s27, %s711_s26 }
  0x44   : > { %p715_p6 = pneg %p714_p1  ;;  %p721_p5 = por %p720_p2, %p719_p8 }
  0x46   : > { %p722_p4 = pnand %p721_p5, %p715_p6 }
  0x48   : > { %725 = shalt.err (!%p722_p4)
}
  0x49   : > { %592 = dma.hbm_to_vmem [thread:$0]  (!%p917_p0), %s959_s18, 128, %s969_s28, %s159_s30, %s815_s7, %s815_s7, %s816_s8  }
  0x4a   : > { %183 = sbr.rel (%p963_p12) target bundleno = 362 (0x16a), region = 28  ;;  %s1003_s4 = sand.u32 (!%p963_p12), 1, %s796_s10  }
  0x4b   : > { %s1006_s6 = sshll.u32 (!%p963_p12), %s1003_s4, 3  ;;  %s186_s5 = scalar_lea.sflag (!%p963_p12), [#allocation3], %s1003_s4 }
  0x4c   : > { %s189_s29 = scalar_lea.vmem (!%p963_p12), [#allocation2], %s1006_s6  ;;  %p1209_p8 = scmp.ne.s32.totalorder (!%p963_p12), %s1203_s21, 0 }
  0x51   : > { %779 = dma.done.wait (%p1209_p8), %s186_s5, 128  }
  0x52   : > { %781 = vsyncadd (%p1209_p8), %s186_s5, 4294967168  ;;  %s195_s25 = scalar_lea.sflag [#allocation6], %s1003_s4  ;;  %s198_s7 = scalar_lea.vmem [#allocation5], %s1006_s6 }
  0x53   : > { %783 = dma.done.wait (%p1209_p8), %s195_s25, 128  }
  0x54   : > { %785 = vsyncadd (%p1209_p8), %s195_s25, 4294967168  ;;  %v1020_v0 = vld [vmem:[%s198_s7] sm:$0x3]  ;;  %v1022_v1 = vld [vmem:[%s198_s7 + $0x2] sm:$0x3]  ;;  %vm362_vm3 = vcmask 1041408  }
  0x55   : > { %v1024_v2 = vld [vmem:[%s198_s7 + $0x4] sm:$0x3]  ;;  %v1026_v3 = vld [vmem:[%s198_s7 + $0x6] sm:$0x3]  ;;  %vm294_vm0 = vcmp.eq.f32.partialorder %v1020_v0, 1.0  ;;  %vm295_vm1 = vcmp.eq.f32.partialorder %v1022_v1, 1.0 }
  0x56   : > { %vm296_vm2 = vcmp.eq.f32.partialorder %v1024_v2, 1.0  ;;  %vm297_vm4 = vcmp.eq.f32.partialorder %v1026_v3, 1.0  ;;  %v818_v4 = vmov 0.0   ;;  %v1041_v8 = vld [vmem:[%s189_s29] sm:$0x3]  ;;  %v318_v32 = vsub.f32 1.0, %v1020_v0 }
  0x57   : > { %v1033_v5 = vsel %vm294_vm0, 1.0, %v818_v4  ;;  %v1036_v6 = vsel %vm295_vm1, 1.0, %v818_v4  ;;  %v1039_v7 = vsel %vm296_vm2, 1.0, %v818_v4  ;;  %v1043_v9 = vld [vmem:[%s189_s29 + $0x2] sm:$0x3]  ;;  %v1054_v14 = vsel %vm297_vm4, 1.0, %v818_v4 }
  0x58   : > { %v395_v10 = vsel %vm362_vm3, %v1033_v5, 0.0  ;;  %v396_v11 = vsel %vm362_vm3, %v1036_v6, 0.0  ;;  %v398_v12 = vsel %vm362_vm3, %v1039_v7, 0.0  ;;  %v1051_v13 = vld [vmem:[%s189_s29 + $0x4] sm:$0x3]  ;;  %v400_v17 = vsel %vm362_vm3, %v1054_v14, 0.0 }
  0x59   : > { %v397_v15 = vadd.f32 %v396_v11, %v395_v10  ;;  %v1056_v16 = vld [vmem:[%s189_s29 + $0x6] sm:$0x3]  ;;  %v234_v18 = vmul.f32 0.5, %v1041_v8  ;;  %v235_v19 = vmul.f32 0.5, %v1043_v9  ;;  %v236_v20 = vmul.f32 0.5, %v1051_v13  ;;  %s569_s8 = sshll.u32 %s804_s12, 7 }
  0x5a   : > { %v237_v22 = vmul.f32 0.5, %v1056_v16  ;;  %v319_v33 = vsub.f32 1.0, %v1022_v1  ;;  %v320_v36 = vsub.f32 1.0, %v1024_v2  ;;  %v321_v39 = vsub.f32 1.0, %v1026_v3  ;;  %s223_s18 = scalar_lea.vmem [#allocation7], %s1006_s6  ;;  %s1148_s26 = scalar_lea.hbm %s1199_s2, %s569_s8 }
  0x5b   : > { %v399_v21 = vadd.f32 %v398_v12, %v397_v15  ;;  %650 = vtanh.f32 %v234_v18  ;;  %v322_v43 = vmul.f32 %v318_v32, %v318_v32  ;;  %vm306_vm5 = vcmp.lt.f32.partialorder %v1020_v0, 1.0  ;;  %s438_s19 = sshll.u32 %s223_s18, 4  ;;  %s424_s12 = scalar_lea.sflag [#allocation4], %s1003_s4  ;;  %s1150_s19 = int_to_ptr.vmem [resolvable:$true] %s438_s19 }
  0x5c   : > { %652 = vtanh.f32 %v235_v19  ;;  %v323_v46 = vmul.f32 %v319_v33, %v319_v33  ;;  %vm307_vm6 = vcmp.lt.f32.partialorder %v1022_v1, 1.0  ;;  %v324_v48 = vmul.f32 %v320_v36, %v320_v36  ;;  %s726_s16 = scalar_lea.vmem %s1150_s19, 128  ;;  %p1210_p3 = scmp.ne.s32.totalorder %s1204_s22, 0 }
  0x5d   : > { %v401_v23 = vadd.f32 %v400_v17, %v399_v21  ;;  %654 = vtanh.f32 %v236_v20  ;;  %v325_v49 = vmul.f32 %v321_v39, %v321_v39  ;;  %vm308_vm7 = vcmp.lt.f32.partialorder %v1024_v2, 1.0  ;;  %p727_p0 = scmp.ne.s32.totalorder %s1150_s19, %s726_s16  ;;  %s819_s20 = smov [#allocation7]  }
  0x5e   : > { %656 = vtanh.f32 %v237_v22  ;;  %v1088_v53 = vsel %vm306_vm5, 1.0, %v818_v4  ;;  %v1091_v54 = vsel %vm307_vm6, 1.0, %v818_v4  ;;  %v1094_v56 = vsel %vm308_vm7, 1.0, %v818_v4  ;;  %s730_s27 = sshll.u32 %s819_s20, 4  ;;  %s731_s27 = int_to_ptr.vmem [resolvable:$false] %s730_s27 }
  0x5f   : > { %402 = vadd.xlane.f32.xlu1 %v401_v23  ;;  %v1096_v57 = vmul.f32 %v322_v43, %v322_v43  ;;  %v1098_v58 = vmul.f32 %v323_v46, %v323_v46  ;;  %v1101_v60 = vmul.f32 %v324_v48, %v324_v48  ;;  %v1103_v61 = vmul.f32 %v325_v49, %v325_v49  ;;  %p728_p12 = pnand %p727_p0, %p1210_p3  ;;  %s732_s6 = scalar_lea.vmem %s731_s27, 256 }
  0x60   : > { %vm309_vm12 = vcmp.lt.f32.partialorder %v1026_v3, 1.0  ;;  %p733_p7 = scmp.lt.s32.totalorder %s1150_s19, %s731_s27  ;;  %p734_p10 = scmp.lt.s32.totalorder %s732_s6, %s726_s16 }
  0x61   : > { %p729_p13 = pneg %p728_p12 }
  0x62   : > { %p735_p9 = por %p734_p10, %p733_p7 }
  0x64   : > { %p736_p11 = pnand %p735_p9, %p729_p13 }
  0x65   : > { %v651_v24 = vpop.eup %650 }
  0x66   : > { %v653_v25 = vpop.eup %652  ;;  %v242_v26 = vmul.f32 0.5, %v651_v24 }
  0x67   : > { %v655_v27 = vpop.eup %654  ;;  %v243_v28 = vmul.f32 0.5, %v653_v25 }
  0x68   : > { %v657_v29 = vpop.eup %656  ;;  %v244_v30 = vmul.f32 0.5, %v655_v27  ;;  %v1064_v31 = vadd.f32 0.5, %v242_v26 }
  0x69   : > { %v245_v34 = vmul.f32 0.5, %v657_v29  ;;  %v1068_v35 = vadd.f32 0.5, %v243_v28 }
  0x6a   : > { %v1071_v37 = vadd.f32 0.5, %v244_v30  ;;  %v250_v38 = vmax.f32 %v1064_v31, 0.0001  ;;  %658 = vlog2.f32 %v1064_v31  ;;  %vm274_vm8 = vcmp.gt.f32.partialorder %v1064_v31, 0.0 }
  0x6b   : > { %v1076_v40 = vadd.f32 0.5, %v245_v34  ;;  %v251_v41 = vmax.f32 %v1068_v35, 0.0001  ;;  %660 = vlog2.f32 %v1068_v35  ;;  %vm275_vm9 = vcmp.gt.f32.partialorder %v1068_v35, 0.0 }
  0x6c   : > { %v252_v42 = vmax.f32 %v1071_v37, 0.0001  ;;  %662 = vlog2.f32 %v1071_v37  ;;  %v254_v45 = vmin.f32 %v250_v38, 0.9999  ;;  %vm276_vm10 = vcmp.gt.f32.partialorder %v1071_v37, 0.0 }
  0x6d   : > { %v253_v44 = vmax.f32 %v1076_v40, 0.0001  ;;  %664 = vlog2.f32 %v1076_v40  ;;  %v255_v47 = vmin.f32 %v251_v41, 0.9999  ;;  %vm277_vm11 = vcmp.gt.f32.partialorder %v1076_v40, 0.0 }
  0x6e   : > { %v256_v50 = vmin.f32 %v252_v42, 0.9999  ;;  %v330_v52 = vsub.f32 1.0, %v254_v45  ;;  %v346_v10 = vmul.f32 %v254_v45, %v254_v45 }
  0x6f   : > { %v257_v51 = vmin.f32 %v253_v44, 0.9999  ;;  %v331_v55 = vsub.f32 1.0, %v255_v47  ;;  %v347_v11 = vmul.f32 %v255_v47, %v255_v47 }
  0x70   : > { %v332_v59 = vsub.f32 1.0, %v256_v50  ;;  %v334_v2 = vmul.f32 %v330_v52, %v330_v52  ;;  %v348_v18 = vmul.f32 %v256_v50, %v256_v50 }
  0x71   : > { %v333_v63 = vsub.f32 1.0, %v257_v51  ;;  %v335_v17 = vmul.f32 %v331_v55, %v331_v55  ;;  %v349_v19 = vmul.f32 %v257_v51, %v257_v51 }
  0x72   : > { %v336_v24 = vmul.f32 %v332_v59, %v332_v59 }
  0x73   : > { %v337_v28 = vmul.f32 %v333_v63, %v333_v63 }
  0x74   : > { %v659_v62 = vpop.eup %658 }
  0x75   : > { %v661_v0 = vpop.eup %660  ;;  %v259_v1 = vmul.f32 0.6931472, %v659_v62 }
  0x76   : > { %v663_v12 = vpop.eup %662  ;;  %v261_v15 = vmul.f32 0.6931472, %v661_v0 }
  0x77   : > { %v665_v20 = vpop.eup %664  ;;  %v263_v21 = vmul.f32 0.6931472, %v663_v12  ;;  %v266_v22 = vmax.f32 %v259_v1, -9.2103405  ;;  %v278_v23 = vsub.f32 %v259_v1, %v1041_v8 }
  0x78   : > { %v265_v25 = vmul.f32 0.6931472, %v665_v20  ;;  %v267_v26 = vmax.f32 %v261_v15, -9.2103405  ;;  %v279_v27 = vsub.f32 %v261_v15, %v1043_v9 }
  0x79   : > { %v268_v29 = vmax.f32 %v263_v21, -9.2103405  ;;  %v270_v30 = vmin.f32 %v266_v22, -0.000100005  ;;  %v280_v32 = vsub.f32 %v263_v21, %v1051_v13  ;;  %v282_v33 = vsel %vm274_vm8, %v278_v23, 0.0 }
  0x7a   : > { %v269_v34 = vmax.f32 %v265_v25, -9.2103405  ;;  %v271_v36 = vmin.f32 %v267_v26, -0.000100005  ;;  %v281_v38 = vsub.f32 %v265_v25, %v1056_v16  ;;  %v283_v8 = vsel %vm275_vm9, %v279_v27, 0.0 }
  0x7b   : > { %v272_v39 = vmin.f32 %v268_v29, -0.000100005  ;;  %v338_v41 = vmul.f32 %v334_v2, %v270_v30  ;;  %v284_v9 = vsel %vm276_vm10, %v280_v32, 0.0  ;;  %v286_v42 = vmax.f32 %v282_v33, -9.2103405 }
  0x7c   : > { %v273_v43 = vmin.f32 %v269_v34, -0.000100005  ;;  %v339_v44 = vmul.f32 %v335_v17, %v271_v36  ;;  %v285_v13 = vsel %vm277_vm11, %v281_v38, 0.0  ;;  %v287_v31 = vmax.f32 %v283_v8, -9.2103405 }
  0x7d   : > { %v340_v45 = vmul.f32 %v336_v24, %v272_v39  ;;  %v342_v46 = vmul.f32 %v1033_v5, %v338_v41  ;;  %v288_v47 = vmax.f32 %v284_v9, -9.2103405  ;;  %v289_v16 = vmax.f32 %v285_v13, -9.2103405 }
  0x7e   : > { %v341_v48 = vmul.f32 %v337_v28, %v273_v43  ;;  %v343_v35 = vmul.f32 %v1036_v6, %v339_v44  ;;  %v290_v49 = vmin.f32 %v286_v42, -0.000100005  ;;  %v291_v50 = vmin.f32 %v287_v31, -0.000100005 }
  0x7f   : > { %v344_v37 = vmul.f32 %v1039_v7, %v340_v45  ;;  %v363_v51 = vsel %vm362_vm3, %v342_v46, 0.0  ;;  %v292_v52 = vmin.f32 %v288_v47, -0.000100005  ;;  %v293_v55 = vmin.f32 %v289_v16, -0.000100005 }
  0x80   : > { %v345_v40 = vmul.f32 %v1054_v14, %v341_v48  ;;  %v364_v59 = vsel %vm362_vm3, %v343_v35, 0.0  ;;  %v350_v62 = vmul.f32 %v346_v10, %v290_v49  ;;  %v351_v63 = vmul.f32 %v347_v11, %v291_v50 }
  0x81   : > { %v365_v5 = vadd.f32 %v364_v59, %v363_v51  ;;  %v366_v0 = vsel %vm362_vm3, %v344_v37, 0.0  ;;  %v352_v1 = vmul.f32 %v348_v18, %v292_v52  ;;  %v353_v2 = vmul.f32 %v349_v19, %v293_v55 }
  0x82   : > { %v368_v6 = vsel %vm362_vm3, %v345_v40, 0.0  ;;  %v567_v7 = vsel %vm309_vm12, 1.0, %v818_v4  ;;  %v354_v12 = vmul.f32 %v350_v62, %v1096_v57  ;;  %v355_v15 = vmul.f32 %v351_v63, %v1098_v58 }
  0x83   : > { %v367_v14 = vadd.f32 %v366_v0, %v365_v5  ;;  %v356_v17 = vmul.f32 %v352_v1, %v1101_v60  ;;  %v357_v10 = vmul.f32 %v353_v2, %v1103_v61  ;;  %v411_v43 = vlaneseq }
  0x84   : > { %v358_v11 = vmul.f32 %v1088_v53, %v354_v12  ;;  %v359_v18 = vmul.f32 %v1091_v54, %v355_v15 }
  0x85   : > { %v369_v19 = vadd.f32 %v368_v6, %v367_v14  ;;  %v360_v20 = vmul.f32 %v1094_v56, %v356_v17  ;;  %v361_v21 = vmul.f32 %v567_v7, %v357_v10  ;;  %v412_v44 = vand.u32 127, %v411_v43 }
  0x86   : > { %v379_v3 = vsel %vm362_vm3, %v358_v11, 0.0  ;;  %v380_v4 = vsel %vm362_vm3, %v359_v18, 0.0 }
  0x87   : > { %370 = vadd.xlane.f32.xlu0 %v369_v19  ;;  %v381_v57 = vadd.f32 %v380_v4, %v379_v3  ;;  %v382_v58 = vsel %vm362_vm3, %v360_v20, 0.0  ;;  %v384_v60 = vsel %vm362_vm3, %v361_v21, 0.0  ;;  %vm413_vm13 = vcmp.eq.s32.totalorder %v412_v44, 0 }
  0x88   : > { %vm416_vm14 = vcmp.eq.s32.totalorder %v412_v44, 1  ;;  %vm419_vm15 = vcmp.eq.s32.totalorder %v412_v44, 2 }
  0x89   : > { %v383_v22 = vadd.f32 %v382_v58, %v381_v57 }
  0x8b   : > { %v385_v61 = vadd.f32 %v384_v60, %v383_v22 }
  0x8d   : > { %386 = vadd.xlane.f32.xlu0 %v385_v61 }
  0xec   : > { %v403_v53 = vpop.xlane.xlu1 %402 }
  0xed   : > { %v404_v23 = vrot.slane %v403_v53, 4 }
  0xef   : > { %v405_v25 = vadd.f32 %v404_v23, %v403_v53 }
  0xf1   : > { %v406_v27 = vrot.slane %v405_v25, 2 }
  0xf3   : > { %v407_v34 = vadd.f32 %v406_v27, %v405_v25 }
  0xf5   : > { %v408_v39 = vrot.slane %v407_v34, 1 }
  0xf7   : > { %v409_v42 = vadd.f32 %v408_v39, %v407_v34 }
 0x114   : > { %v371_v54 = vpop.xlane.xlu0 %370 }
 0x115   : > { %v372_v24 = vrot.slane %v371_v54, 4 }
 0x117   : > { %v373_v56 = vadd.f32 %v372_v24, %v371_v54 }
 0x119   : > { %v374_v26 = vrot.slane %v373_v56, 2 }
 0x11a   : > { %v387_v28 = vpop.xlane.xlu0 %386 }
 0x11b   : > { %v388_v29 = vrot.slane %v387_v28, 4  ;;  %v375_v30 = vadd.f32 %v374_v26, %v373_v56 }
 0x11d   : > { %v389_v32 = vadd.f32 %v388_v29, %v387_v28  ;;  %v376_v33 = vrot.slane %v375_v30, 1 }
 0x11f   : > { %v390_v36 = vrot.slane %v389_v32, 2  ;;  %v377_v38 = vadd.f32 %v376_v33, %v375_v30 }
 0x121   : > { %v391_v8 = vadd.f32 %v390_v36, %v389_v32  ;;  %574 = vpush %v377_v38 }
 0x123   : > { %v392_v41 = vrot.slane %v391_v8, 1 }
 0x125   : > { %v393_v9 = vadd.f32 %v392_v41, %v391_v8 }
 0x127   : > { %576 = vpush %v393_v9 }
 0x128   : > { %578 = vpush %v409_v42 }
 0x152   : > { %s575_s21 = spop %574 }
 0x153   : > { %v414_v13 = vstv %s575_s21 }
 0x154   : > { %v415_v31 = vsel %vm413_vm13, %v414_v13, 0.0 }
 0x158   : > { %s577_s28 = spop %576 }
 0x159   : > { %v417_v45 = vstv %s577_s28  ;;  %s579_s30 = spop %578 }
 0x15a   : > { %v418_v46 = vsel %vm416_vm14, %v417_v45, %v415_v31  ;;  %v420_v47 = vstv %s579_s30 }
 0x15b   : > { %v421_v16 = vsel %vm419_vm15, %v420_v47, %v418_v46 }
 0x15c   : > { %422 = vst [vmem:[%s223_s18] sm:$0xff] %v421_v16 }
 0x15d   : > { %739 = shalt.err (!%p736_p11)
}
 0x15e   : > { %s740_s4 = scalar_lea.hbm %s1148_s26, 128  ;;  %s744_s25 = scalar_lea.hbm %s1199_s2, 256 }
 0x15f   : > { %p741_p1 = scmp.ne.s32.totalorder %s1148_s26, %s740_s4  ;;  %p745_p5 = scmp.lt.u32.totalorder %s1148_s26, %s1199_s2 }
 0x160   : > { %p746_p4 = scmp.lt.u32.totalorder %s744_s25, %s740_s4  ;;  %p748_p0 = scmp.lt.u32.totalorder %s740_s4, %s1148_s26 }
 0x161   : > { %p742_p6 = pnand %p741_p1, %p1210_p3 }
 0x162   : > { %p747_p8 = por %p746_p4, %p745_p5 }
 0x163   : > { %p743_p2 = pneg %p742_p6 }
 0x164   : > { %p749_p12 = por %p748_p0, %p747_p8 }
 0x166   : > { %p750_p13 = pnand %p749_p12, %p743_p2 }
 0x168   : > { %753 = shalt.err (!%p750_p13)
}
 0x169   : > { %584 = dma.vmem_to_hbm [thread:$0]  (%p1210_p3), %s1150_s19, 128, %s1148_s26, %s424_s12  }
 0x16a PF: > { %s450_s8 = sand.u32 1, %s792_s9   ;;  %p1211_p7 = scmp.ne.s32.totalorder %s1205_s24, 0 }
 0x16b   : > { %p1212_p10 = scmp.ge.s32.totalorder %s812_s14, 2  ;;  %s451_s18 = scalar_lea.sflag [#allocation4], %s450_s8 }
 0x16d   : > { %p594_p9 = pnand %p1212_p10, %p1211_p7 }
 0x16f   : > { %787 = dma.done.wait (!%p594_p9), %s451_s18, 128  }
 0x170   : > { %789 = vsyncadd (!%p594_p9), %s451_s18, 4294967168  ;;  %s21_s14 = sadd.s32 1, %s812_s14   ;;  %s1213_s9 = smov %s796_s10 }
 0x171   : > { %p18_p11 = scmp.ge.s32.totalorder %s21_s14, 4   ;;  %s1214_s10 = smov %s800_s11 }
 0x172   : > { %s1215_s11 = smov %s891_s23  ;;  %s1216_s12 = smov %s808_s13 }
 0x173   : > { %s1217_s13 = smov %s1219_s17  ;;  %20 = sbr.rel (!%p18_p11) target bundleno = 8 (0x8), region = 86 }
 0x17a   :  { %456 = vsyncpa [#allocation3], 1 }
 0x17b   :  { %458 = vsyncpa [#allocation3 + $0x1], 1 }
 0x17c   :  { %459 = vsyncpa [#allocation6], 1 }
 0x17d   :  { %461 = vsyncpa [#allocation6 + $0x1], 1 }
 0x17e   :  { %462 = vsyncpa [#allocation4], 1 }
 0x17f   :  { %464 = vsyncpa [#allocation4 + $0x1], 1 }

</bundles_post_ra>
